<compile_context>
chip_gen: v7x
topology: tpu7x:2x2x1
jax: 0.10.0
libtpu: 0.0.40
codegen_flags: <defaults>
</compile_context>

<pallas_src>
import math

import jax
import jax.numpy as jnp
from jax import lax
from jax.experimental import pallas as pl
from jax.experimental.pallas import tpu as pltpu

S_DIM = 24      # BipedalWalker-v3 observation dim
A_DIM = 4       # BipedalWalker-v3 action dim
HIDDEN = 128
OUT_ROWS = 8    # packed output rows: 0..3 action, 4 log_prob, 5..7 padding
_TB_CAP = 4096  # batch-tile cap (~8 MiB live per tile incl. double buffers)
_HALF_LOG_2PI = 0.5 * math.log(2.0 * math.pi)


def _policy_kernel(x_ref, epsT_ref, w1_ref, b1_ref, w2_ref, b2_ref,
                   wm_ref, bm_ref, logstd_ref, out_ref):
    # x_ref: [TB, S_DIM] batch-major f32 (straight from the rollout buffer).
    # Weights are bf16 [out, in]; biases / logstd are f32 [out, 1].
    # Hidden activations are feature-major [feat, TB]: batch on the lane axis.
    xb = x_ref[...].astype(jnp.bfloat16)                              # [TB, S]

    # Layer 1: contract the last dim of both operands -> [H, TB] directly from
    # the batch-major block (no wrapper/XLA transpose, no in-kernel transpose).
    h1 = lax.dot_general(w1_ref[...], xb, (((1,), (1,)), ((), ())),
                         preferred_element_type=jnp.float32)
    h1 = jnp.maximum(h1 + b1_ref[...], 0.0)                           # [H, TB]

    # Layer 2.
    h2 = jnp.dot(w2_ref[...], h1.astype(jnp.bfloat16),
                 preferred_element_type=jnp.float32)
    h2 = jnp.maximum(h2 + b2_ref[...], 0.0)                           # [H, TB]

    # DiagGaussian head: mean = fc_mean(feature); logstd = AddBias(zeros).
    mean = jnp.dot(wm_ref[...], h2.astype(jnp.bfloat16),
                   preferred_element_type=jnp.float32) + bm_ref[...]  # [A, TB]

    logstd = logstd_ref[...]                                          # [A, 1]
    std = jnp.exp(logstd)

    # Reparameterized sample.
    eps = epsT_ref[...]                                               # [A, TB]
    action = mean + std * eps

    # FixedNormal.log_probs(action): action - mean == std * eps exactly, so
    # -(action-mean)^2/(2*var) == -0.5*eps^2 (exact, no divide, f32 precision).
    per_dim = -0.5 * (eps * eps) - logstd - _HALF_LOG_2PI             # [A, TB]
    logp = jnp.sum(per_dim, axis=0, keepdims=True)                    # [1, TB]

    # Assemble the full [OUT_ROWS, TB] slab in registers -> one aligned store.
    pad = jnp.zeros((OUT_ROWS - A_DIM - 1, action.shape[1]), jnp.float32)
    out_ref[...] = jnp.concatenate([action, logp, pad], axis=0)


def _batch_tile(b):
    """Pick the batch tile TB.

    * b < 256: one tile covering the whole (possibly ragged) batch; TB == b
      satisfies the BlockSpec rule "divisible by (8,128) OR equal to the dim".
    * b >= 256: split into >= 2 tiles (multiples of 128, capped at _TB_CAP) so
      ("parallel",) megacore sharding engages on v7x, while big tiles amortize
      the per-grid-step overhead on single-core v5e/v6e.  The ragged final tile
      is boundary-masked by Pallas; garbage lanes never leave the kernel.
    """
    if b < 256:
        return b
    half = ((-(-b // 2)) + 127) // 128 * 128   # round_up(ceil(b/2), 128)
    return min(half, _TB_CAP)


def policy_net_forward(state, params, noise_t, deterministic=False):
    """Forward pass of PolicyNet.

    state:   [B, s_dim] f32, batch-major (as produced by the environment).
    noise_t: [a_dim, B] f32 standard-normal draws (feature-major eps).  The
             caller draws this fresh each step, so the feature-major layout is
             free and removes any transpose from the hot path.
    Returns (action [B, a_dim], log_prob [B]).
    deterministic=True reproduces dist.mode(): action = mean (same as eps = 0).
    """
    B = state.shape[0]
    if deterministic:
        noise_t = jnp.zeros_like(noise_t)

    TB = _batch_tile(B)
    grid = (pl.cdiv(B, TB),)

    batch_rows = lambda i: (i, 0)   # state tiles move along the batch (sublane) axis
    batch_cols = lambda i: (0, i)   # eps / output tiles move along the lane axis
    resident = lambda i: (0, 0)     # weights stay VMEM-resident across all tiles

    # bf16 weights for the MXU (tiny one-off casts, ~40 KB total).
    w1 = params["w1"].astype(jnp.bfloat16)
    w2 = params["w2"].astype(jnp.bfloat16)
    wm = params["wm"].astype(jnp.bfloat16)

    param_bytes = (
        2 * (HIDDEN * S_DIM + HIDDEN * HIDDEN + A_DIM * HIDDEN)      # bf16 weights
        + 4 * (HIDDEN + HIDDEN + A_DIM + A_DIM)                      # f32 biases+logstd
    )
    cost = pl.CostEstimate(
        flops=2 * (S_DIM * HIDDEN + HIDDEN * HIDDEN + HIDDEN * A_DIM) * B,
        transcendentals=A_DIM,
        bytes_accessed=(S_DIM + A_DIM + OUT_ROWS) * 4 * B + param_bytes,
    )

    out = pl.pallas_call(
        _policy_kernel,
        out_shape=jax.ShapeDtypeStruct((OUT_ROWS, B), jnp.float32),
        grid=grid,
        in_specs=[
            pl.BlockSpec((TB, S_DIM), batch_rows),        # state (batch-major)
            pl.BlockSpec((A_DIM, TB), batch_cols),        # eps^T (feature-major)
            pl.BlockSpec((HIDDEN, S_DIM), resident),      # w1 (bf16) [out, in]
            pl.BlockSpec((HIDDEN, 1), resident),          # b1 [out, 1]
            pl.BlockSpec((HIDDEN, HIDDEN), resident),     # w2 (bf16)
            pl.BlockSpec((HIDDEN, 1), resident),          # b2
            pl.BlockSpec((A_DIM, HIDDEN), resident),      # wm (bf16)
            pl.BlockSpec((A_DIM, 1), resident),           # bm
            pl.BlockSpec((A_DIM, 1), resident),           # logstd
        ],
        out_specs=pl.BlockSpec((OUT_ROWS, TB), batch_cols),
        compiler_params=pltpu.CompilerParams(
            dimension_semantics=("parallel",),            # megacore on v7x
            vmem_limit_bytes=32 * 1024 * 1024,
        ),
        cost_estimate=cost,
    )(state, noise_t,
      w1, params["b1"], w2, params["b2"],
      wm, params["bm"], params["logstd"])

    action = out[:A_DIM, :].T           # [B, A_DIM]
    log_prob = out[A_DIM, :]            # [B]
    return action, log_prob


def init_params(key):
    """PyTorch nn.Linear default init (U[-1/sqrt(fan_in), +]); weights stored
    in the torch [out, in] layout (f32 master copy), biases as [out, 1]."""
    ks = jax.random.split(key, 6)

    def linear(kw, kb, fan_in, fan_out):
        bound = 1.0 / math.sqrt(fan_in)
        w = jax.random.uniform(kw, (fan_out, fan_in), jnp.float32, -bound, bound)
        b = jax.random.uniform(kb, (fan_out, 1), jnp.float32, -bound, bound)
        return w, b

    w1, b1 = linear(ks[0], ks[1], S_DIM, HIDDEN)
    w2, b2 = linear(ks[2], ks[3], HIDDEN, HIDDEN)
    wm, bm = linear(ks[4], ks[5], HIDDEN, A_DIM)
    # AddBias is initialized with torch.zeros(a_dim) -> logstd starts at 0.
    logstd = jnp.zeros((A_DIM, 1), jnp.float32)
    return {"w1": w1, "b1": b1, "w2": w2, "b2": b2,
            "wm": wm, "bm": bm, "logstd": logstd}


def _reference_forward(state, params, noise_t):
    """Pure-JAX f32 reference matching the PyTorch module (noise_t is [A, B])."""
    h = jax.nn.relu(state @ params["w1"].T + params["b1"][:, 0])
    h = jax.nn.relu(h @ params["w2"].T + params["b2"][:, 0])
    mean = h @ params["wm"].T + params["bm"][:, 0]
    logstd = params["logstd"][:, 0]
    std = jnp.exp(logstd)
    action = mean + std * noise_t.T
    logp = jnp.sum(-((action - mean) ** 2) / (2.0 * std * std)
                   - logstd - _HALF_LOG_2PI, axis=-1)
    return action, logp


def _check(B, params, k_state, k_noise):
    state = jax.random.normal(k_state, (B, S_DIM), jnp.float32)
    noise_t = jax.random.normal(k_noise, (A_DIM, B), jnp.float32)
    action, log_prob = policy_net_forward(state, params, noise_t)
    jax.block_until_ready((action, log_prob))

    ref_action, ref_logp = _reference_forward(state, params, noise_t)
    assert action.shape == (B, A_DIM)
    assert log_prob.shape == (B,)
    assert bool(jnp.all(jnp.isfinite(action))) and bool(jnp.all(jnp.isfinite(log_prob)))
    # bf16 MXU path -> loosened tolerance on action; log_prob is exact-in-f32
    # (depends only on eps and logstd), so it stays tight.
    assert bool(jnp.allclose(action, ref_action, atol=5e-2, rtol=5e-2))
    assert bool(jnp.allclose(log_prob, ref_logp, atol=1e-3, rtol=1e-3))


if __name__ == "__main__":
    key = jax.random.PRNGKey(0)
    k_params, k_s1, k_n1, k_s2, k_n2 = jax.random.split(key, 5)
    params = init_params(k_params)

    # Small batch: single tile (TB == B) path.
    _check(8, params, k_s1, k_n1)
    # Mid batch: multi-tile grid + ragged final tile (boundary-masked) path.
    _check(300, params, k_s2, k_n2)

    print("KERNEL_OK")
</pallas_src>

<mosaic_0001>
module attributes {stable_mosaic.version = 11 : i64} {
  func.func @_policy_kernel(%arg0: i32, %arg1: memref<8x24xf32, #tpu.memory_space<vmem>>, %arg2: memref<4x8xf32, #tpu.memory_space<vmem>>, %arg3: memref<128x24xbf16, #tpu.memory_space<vmem>>, %arg4: memref<128x1xf32, #tpu.memory_space<vmem>>, %arg5: memref<128x128xbf16, #tpu.memory_space<vmem>>, %arg6: memref<128x1xf32, #tpu.memory_space<vmem>>, %arg7: memref<4x128xbf16, #tpu.memory_space<vmem>>, %arg8: memref<4x1xf32, #tpu.memory_space<vmem>>, %arg9: memref<4x1xf32, #tpu.memory_space<vmem>>, %arg10: memref<8x8xf32, #tpu.memory_space<vmem>>) attributes {dimension_semantics = [#tpu.dimension_semantics<parallel>], iteration_bounds = array<i64: 1>, scalar_prefetch = 0 : i64, scratch_operands = 0 : i64, tpu.core_type = #tpu.core_type<tc>, window_params = [{transform_indices = @transform_0, window_bounds = array<i64: 8, 24>}, {transform_indices = @transform_1, window_bounds = array<i64: 4, 8>}, {pipeline_mode = #tpu.pipeline_mode<synchronous>, transform_indices = @transform_2, window_bounds = array<i64: 128, 24>}, {pipeline_mode = #tpu.pipeline_mode<synchronous>, transform_indices = @transform_3, window_bounds = array<i64: 128, 1>}, {pipeline_mode = #tpu.pipeline_mode<synchronous>, transform_indices = @transform_4, window_bounds = array<i64: 128, 128>}, {pipeline_mode = #tpu.pipeline_mode<synchronous>, transform_indices = @transform_5, window_bounds = array<i64: 128, 1>}, {pipeline_mode = #tpu.pipeline_mode<synchronous>, transform_indices = @transform_6, window_bounds = array<i64: 4, 128>}, {pipeline_mode = #tpu.pipeline_mode<synchronous>, transform_indices = @transform_7, window_bounds = array<i64: 4, 1>}, {pipeline_mode = #tpu.pipeline_mode<synchronous>, transform_indices = @transform_8, window_bounds = array<i64: 4, 1>}, {transform_indices = @transform_9, window_bounds = array<i64: 8, 8>}]} {
    %c0 = arith.constant 0 : index
    %c0_0 = arith.constant 0 : index
    %0 = vector.load %arg1[%c0, %c0_0] : memref<8x24xf32, #tpu.memory_space<vmem>>, vector<8x24xf32>
    %1 = arith.truncf %0 : vector<8x24xf32> to vector<8x24xbf16>
    %c0_1 = arith.constant 0 : index
    %c0_2 = arith.constant 0 : index
    %2 = vector.load %arg3[%c0_1, %c0_2] : memref<128x24xbf16, #tpu.memory_space<vmem>>, vector<128x24xbf16>
    %cst = arith.constant dense<0.000000e+00> : vector<128x8xf32>
    %3 = tpu.matmul %2, %1, %cst {dimension_numbers = #tpu.dot_dimension_numbers<[1], [1], [0], [0], [0, 0, 1, 0], [], []>} : vector<128x24xbf16>, vector<8x24xbf16>, vector<128x8xf32> -> vector<128x8xf32>
    %c0_3 = arith.constant 0 : index
    %c0_4 = arith.constant 0 : index
    %4 = vector.load %arg4[%c0_3, %c0_4] : memref<128x1xf32, #tpu.memory_space<vmem>>, vector<128x1xf32>
    %5 = vector.broadcast %4 : vector<128x1xf32> to vector<128x8xf32>
    %6 = arith.addf %3, %5 : vector<128x8xf32>
    %cst_5 = arith.constant 0.000000e+00 : f32
    %7 = vector.broadcast %cst_5 : f32 to vector<128x8xf32>
    %8 = arith.maximumf %6, %7 : vector<128x8xf32>
    %c0_6 = arith.constant 0 : index
    %c0_7 = arith.constant 0 : index
    %9 = vector.load %arg5[%c0_6, %c0_7] : memref<128x128xbf16, #tpu.memory_space<vmem>>, vector<128x128xbf16>
    %10 = arith.truncf %8 : vector<128x8xf32> to vector<128x8xbf16>
    %cst_8 = arith.constant dense<0.000000e+00> : vector<128x8xf32>
    %11 = tpu.matmul %9, %10, %cst_8 {dimension_numbers = #tpu.dot_dimension_numbers<[1], [0], [0], [1], [0, 0, 1, 1], [], []>} : vector<128x128xbf16>, vector<128x8xbf16>, vector<128x8xf32> -> vector<128x8xf32>
    %c0_9 = arith.constant 0 : index
    %c0_10 = arith.constant 0 : index
    %12 = vector.load %arg6[%c0_9, %c0_10] : memref<128x1xf32, #tpu.memory_space<vmem>>, vector<128x1xf32>
    %13 = vector.broadcast %12 : vector<128x1xf32> to vector<128x8xf32>
    %14 = arith.addf %11, %13 : vector<128x8xf32>
    %cst_11 = arith.constant 0.000000e+00 : f32
    %15 = vector.broadcast %cst_11 : f32 to vector<128x8xf32>
    %16 = arith.maximumf %14, %15 : vector<128x8xf32>
    %c0_12 = arith.constant 0 : index
    %c0_13 = arith.constant 0 : index
    %17 = vector.load %arg7[%c0_12, %c0_13] : memref<4x128xbf16, #tpu.memory_space<vmem>>, vector<4x128xbf16>
    %18 = arith.truncf %16 : vector<128x8xf32> to vector<128x8xbf16>
    %cst_14 = arith.constant dense<0.000000e+00> : vector<4x8xf32>
    %19 = tpu.matmul %17, %18, %cst_14 {dimension_numbers = #tpu.dot_dimension_numbers<[1], [0], [0], [1], [0, 0, 1, 1], [], []>} : vector<4x128xbf16>, vector<128x8xbf16>, vector<4x8xf32> -> vector<4x8xf32>
    %c0_15 = arith.constant 0 : index
    %c0_16 = arith.constant 0 : index
    %20 = vector.load %arg8[%c0_15, %c0_16] : memref<4x1xf32, #tpu.memory_space<vmem>>, vector<4x1xf32>
    %21 = vector.broadcast %20 : vector<4x1xf32> to vector<4x8xf32>
    %22 = arith.addf %19, %21 : vector<4x8xf32>
    %c0_17 = arith.constant 0 : index
    %c0_18 = arith.constant 0 : index
    %23 = vector.load %arg9[%c0_17, %c0_18] : memref<4x1xf32, #tpu.memory_space<vmem>>, vector<4x1xf32>
    %24 = math.exp %23 : vector<4x1xf32>
    %c0_19 = arith.constant 0 : index
    %c0_20 = arith.constant 0 : index
    %25 = vector.load %arg2[%c0_19, %c0_20] : memref<4x8xf32, #tpu.memory_space<vmem>>, vector<4x8xf32>
    %26 = vector.broadcast %24 : vector<4x1xf32> to vector<4x8xf32>
    %27 = arith.mulf %26, %25 : vector<4x8xf32>
    %28 = arith.addf %22, %27 : vector<4x8xf32>
    %29 = arith.mulf %25, %25 : vector<4x8xf32>
    %cst_21 = arith.constant -5.000000e-01 : f32
    %30 = vector.broadcast %cst_21 : f32 to vector<4x8xf32>
    %31 = arith.mulf %30, %29 : vector<4x8xf32>
    %32 = vector.broadcast %23 : vector<4x1xf32> to vector<4x8xf32>
    %33 = arith.subf %31, %32 : vector<4x8xf32>
    %cst_22 = arith.constant 0.918938517 : f32
    %34 = vector.broadcast %cst_22 : f32 to vector<4x8xf32>
    %35 = arith.subf %33, %34 : vector<4x8xf32>
    %cst_23 = arith.constant dense<0.000000e+00> : vector<8xf32>
    %36 = vector.multi_reduction <add>, %35, %cst_23 [0] : vector<4x8xf32> to vector<8xf32>
    %37 = vector.shape_cast %36 : vector<8xf32> to vector<1x8xf32>
    %cst_24 = arith.constant 0.000000e+00 : f32
    %38 = vector.broadcast %cst_24 : f32 to vector<3x8xf32>
    %39 = tpu.concatenate %28, %37, %38 in 0 : vector<4x8xf32>, vector<1x8xf32>, vector<3x8xf32> -> vector<8x8xf32>
    %c0_25 = arith.constant 0 : index
    %c0_26 = arith.constant 0 : index
    %40 = vector.load %arg10[%c0_25, %c0_26] : memref<8x8xf32, #tpu.memory_space<vmem>>, vector<8x8xf32>
    tpu.vector_store %arg10[%c0_25, %c0_26], %39 {strides = array<i32>} : memref<8x8xf32, #tpu.memory_space<vmem>>, vector<8x8xf32>,
    return
  }
  func.func @transform_0(%arg0: i32) -> (i32, i32) {
    %c0_i32 = arith.constant 0 : i32
    %c0_i32_0 = arith.constant 0 : i32
    return %arg0, %c0_i32 : i32, i32
  }
  func.func @transform_1(%arg0: i32) -> (i32, i32) {
    %c0_i32 = arith.constant 0 : i32
    %c0_i32_0 = arith.constant 0 : i32
    return %c0_i32, %arg0 : i32, i32
  }
  func.func @transform_2(%arg0: i32) -> (i32, i32) {
    %c0_i32 = arith.constant 0 : i32
    %c0_i32_0 = arith.constant 0 : i32
    %c0_i32_1 = arith.constant 0 : i32
    return %c0_i32, %c0_i32_0 : i32, i32
  }
  func.func @transform_3(%arg0: i32) -> (i32, i32) {
    %c0_i32 = arith.constant 0 : i32
    %c0_i32_0 = arith.constant 0 : i32
    %c0_i32_1 = arith.constant 0 : i32
    return %c0_i32, %c0_i32_0 : i32, i32
  }
  func.func @transform_4(%arg0: i32) -> (i32, i32) {
    %c0_i32 = arith.constant 0 : i32
    %c0_i32_0 = arith.constant 0 : i32
    %c0_i32_1 = arith.constant 0 : i32
    return %c0_i32, %c0_i32_0 : i32, i32
  }
  func.func @transform_5(%arg0: i32) -> (i32, i32) {
    %c0_i32 = arith.constant 0 : i32
    %c0_i32_0 = arith.constant 0 : i32
    %c0_i32_1 = arith.constant 0 : i32
    return %c0_i32, %c0_i32_0 : i32, i32
  }
  func.func @transform_6(%arg0: i32) -> (i32, i32) {
    %c0_i32 = arith.constant 0 : i32
    %c0_i32_0 = arith.constant 0 : i32
    %c0_i32_1 = arith.constant 0 : i32
    return %c0_i32, %c0_i32_0 : i32, i32
  }
  func.func @transform_7(%arg0: i32) -> (i32, i32) {
    %c0_i32 = arith.constant 0 : i32
    %c0_i32_0 = arith.constant 0 : i32
    %c0_i32_1 = arith.constant 0 : i32
    return %c0_i32, %c0_i32_0 : i32, i32
  }
  func.func @transform_8(%arg0: i32) -> (i32, i32) {
    %c0_i32 = arith.constant 0 : i32
    %c0_i32_0 = arith.constant 0 : i32
    %c0_i32_1 = arith.constant 0 : i32
    return %c0_i32, %c0_i32_0 : i32, i32
  }
  func.func @transform_9(%arg0: i32) -> (i32, i32) {
    %c0_i32 = arith.constant 0 : i32
    %c0_i32_0 = arith.constant 0 : i32
    return %c0_i32, %arg0 : i32, i32
  }
}

</mosaic_0001>

<bundles_post_ra>
// kernel: tpu_custom_call.1
= control target key start
LH: loop header
LB: loop body
LE: loop exit
PB: predicated region body
PF: predicated region fallthrough
CT: control target
= control target key end

     0   :  { %vm188_vm0 = vcmask 195584   ;;  %v891_v3 = vmov 0   ;;  %s1135_s0 = inlined_call_operand.vmem [shape: f32[8,24], index: 0, kind: input, shape index: {}]   ;;  %s1136_s1 = inlined_call_operand.vmem [shape: f32[4,8], index: 1, kind: input, shape index: {}]   ;;  %s1137_s2 = inlined_call_operand.vmem [shape: bf16[128,24], index: 2, kind: input, shape index: {}]   ;;  %s1138_s3 = inlined_call_operand.vmem [shape: f32[128,1], index: 3, kind: input, shape index: {}]   ;;  %s1139_s4 = inlined_call_operand.vmem [shape: bf16[128,128], index: 4, kind: input, shape index: {}]   ;;  %s1140_s5 = inlined_call_operand.vmem [shape: f32[128,1], index: 5, kind: input, shape index: {}]   ;;  %s1141_s6 = inlined_call_operand.vmem [shape: bf16[4,128], index: 6, kind: input, shape index: {}]   ;;  %s1142_s7 = inlined_call_operand.vmem [shape: f32[4,1], index: 7, kind: input, shape index: {}]   ;;  %s1143_s8 = inlined_call_operand.vmem [shape: f32[4,1], index: 8, kind: input, shape index: {}]   ;;  %s1144_s9 = inlined_call_operand.hbm [shape: f32[8,8], index: 9, kind: output, shape index: {}]  }
   0x1   :  { %v34_v0 = vld [vmem:[%s1135_s0] sm:$0xff]  ;;  %847 = vset.pattern.permute.xlu0 %v891_v3  ;;  %848 = vset.pattern.permute.xlu1 %v891_v3  ;;  %v53_v6 = vld [vmem:[%s1138_s3 + $0x8] sm:$0xff]  ;;  %v54_v8 = vld [vmem:[%s1138_s3 + $0x10] sm:$0xff] }
   0x2   :  { %v35_v1 = vpack.c.bf16 %v34_v0, %v34_v0  ;;  %v849_v2 = vld [vmem:[%s1137_s2] sm:$0xff]   ;;  %v850_v7 = vld [vmem:[%s1137_s2 + $0x8] sm:$0xff]   ;;  %v851_v9 = vld [vmem:[%s1137_s2 + $0x10] sm:$0xff]   ;;  %80 = vperm.xlu1 %848, %v54_v8  }
   0x3   :  { %774 = vmatprep.mubr.msk.bf16.mxu0 %vm188_vm0, %v849_v2  ;;  %v52_v5 = vld [vmem:[%s1138_s3] sm:$0xff]  ;;  %v55_v11 = vld [vmem:[%s1138_s3 + $0x18] sm:$0xff]  ;;  %v57_v12 = vld [vmem:[%s1138_s3 + $0x28] sm:$0xff] }
   0x4   :  { %842 = vmatprep.subr.msk.bf16.mxu0 %vm188_vm0, %v35_v1  ;;  %v214_v4 = vsel %vm188_vm0, %v35_v1, 0  ;;  %70 = vperm.xlu0 %847, %v52_v5   ;;  %v56_v10 = vld [vmem:[%s1138_s3 + $0x20] sm:$0xff]  ;;  %v58_v13 = vld [vmem:[%s1138_s3 + $0x30] sm:$0xff]  ;;  %v852_v14 = vld [vmem:[%s1137_s2 + $0x18] sm:$0xff]  }
   0x5   :  { %773 = vmatpush3.bf16.xpose.msra.mxu0 %v214_v4  ;;  %v853_v15 = vld [vmem:[%s1137_s2 + $0x20] sm:$0xff]   ;;  %v59_v16 = vld [vmem:[%s1138_s3 + $0x38] sm:$0xff]  ;;  %v61_v18 = vld [vmem:[%s1138_s3 + $0x48] sm:$0xff] }
   0x6   :  { %85 = vperm.xlu1 %848, %v55_v11   ;;  %v60_v17 = vld [vmem:[%s1138_s3 + $0x40] sm:$0xff]  ;;  %v62_v19 = vld [vmem:[%s1138_s3 + $0x50] sm:$0xff]  ;;  %v854_v20 = vld [vmem:[%s1137_s2 + $0x28] sm:$0xff]  }
   0x7   :  { %v855_v21 = vld [vmem:[%s1137_s2 + $0x30] sm:$0xff]   ;;  %v63_v22 = vld [vmem:[%s1138_s3 + $0x58] sm:$0xff] }
   0x8   :  { %75 = vperm.xlu0 %847, %v53_v6  }
   0xa   :  { %95 = vperm.xlu1 %848, %v57_v12  }
   0xc   :  { %775 = vmatmul.mubr.msk.bf16.vlgmr.msra.gmra.mrb[0].mxu0 %vm188_vm0, %v850_v7  ;;  %90 = vperm.xlu0 %847, %v56_v10  }
   0xd   :  { %778 = vmatprep.mubr.msk.bf16.mxu0 %vm188_vm0, %v851_v9 }
   0xe   :  { %105 = vperm.xlu1 %848, %v59_v16  }
  0x10   :  { %100 = vperm.xlu0 %847, %v58_v13  }
  0x12   :  { %115 = vperm.xlu1 %848, %v61_v18  }
  0x14   :  { %779 = vmatmul.mubr.msk.bf16.gmra.mrb[4].mxu0 %vm188_vm0, %v852_v14  ;;  %110 = vperm.xlu0 %847, %v60_v17  }
  0x15   :  { %782 = vmatprep.mubr.msk.bf16.mxu0 %vm188_vm0, %v853_v15 }
  0x18   :  { %120 = vperm.xlu0 %847, %v62_v19  }
  0x19   :  { %14 = vsyncpa [#allocation3], 0  ;;  %v64_v23 = vld [vmem:[%s1138_s3 + $0x60] sm:$0xff]  ;;  %125 = vperm.xlu1 %848, %v63_v22   ;;  %v65_v24 = vld [vmem:[%s1138_s3 + $0x68] sm:$0xff]  ;;  %vm893_vm1 = vmmov 0   ;;  %vm685_vm2 = vcmask 60416  }
  0x1a   :  { %v66_v25 = vld [vmem:[%s1138_s3 + $0x70] sm:$0xff]  ;;  %v856_v26 = vld [vmem:[%s1137_s2 + $0x38] sm:$0xff]   ;;  %v353_v28 = vld [vmem:[%s1140_s5] sm:$0xff]  ;;  %vm693_vm3 = vcmask 1043456   ;;  %vm695_vm4 = vcmask 1044480   ;;  %vm697_vm5 = vcmask 64512  }
  0x1b   :  { %v67_v27 = vld [vmem:[%s1138_s3 + $0x78] sm:$0xff]  ;;  %v354_v29 = vld [vmem:[%s1140_s5 + $0x8] sm:$0xff]  ;;  %v355_v30 = vld [vmem:[%s1140_s5 + $0x10] sm:$0xff] }
  0x1c   :  { %783 = vmatmul.mubr.msk.bf16.gmra.mrb[8].mxu0 %vm188_vm0, %v854_v20  ;;  %130 = vperm.xlu0 %847, %v64_v23   ;;  %v356_v31 = vld [vmem:[%s1140_s5 + $0x18] sm:$0xff]  ;;  %v357_v32 = vld [vmem:[%s1140_s5 + $0x20] sm:$0xff]  ;;  %v358_v33 = vld [vmem:[%s1140_s5 + $0x28] sm:$0xff] }
  0x1d   :  { %786 = vmatprep.mubr.msk.bf16.mxu0 %vm188_vm0, %v855_v21  ;;  %135 = vperm.xlu1 %848, %v65_v24   ;;  %v359_v34 = vld [vmem:[%s1140_s5 + $0x30] sm:$0xff]  ;;  %v360_v35 = vld [vmem:[%s1140_s5 + $0x38] sm:$0xff]  ;;  %v361_v36 = vld [vmem:[%s1140_s5 + $0x40] sm:$0xff] }
  0x1e   :  { %v362_v37 = vld [vmem:[%s1140_s5 + $0x48] sm:$0xff]  ;;  %v665_v38 = vld [vmem:[%s1143_s8] sm:$0xf]  ;;  %v363_v39 = vld [vmem:[%s1140_s5 + $0x50] sm:$0xff] }
  0x1f   :  { %v666_v40 = vmul.f32 1.442695, %v665_v38  ;;  %v364_v41 = vld [vmem:[%s1140_s5 + $0x58] sm:$0xff]  ;;  %v365_v42 = vld [vmem:[%s1140_s5 + $0x60] sm:$0xff]  ;;  %v366_v43 = vld [vmem:[%s1140_s5 + $0x68] sm:$0xff] }
  0x20   :  { %140 = vperm.xlu0 %847, %v66_v25   ;;  %v367_v44 = vld [vmem:[%s1140_s5 + $0x70] sm:$0xff]  ;;  %v368_v45 = vld [vmem:[%s1140_s5 + $0x78] sm:$0xff]  ;;  %v619_v46 = vld [vmem:[%s1142_s7] sm:$0xf] }
  0x21   :  { %145 = vperm.xlu1 %848, %v67_v27   ;;  %865 = vpow2.f32 %v666_v40  ;;  %v857_v48 = vld [vmem:[%s1139_s4] sm:$0xff]  }
  0x22   :  { %806 = vmatprep.mubr.bf16.mxu1 %v857_v48 }
  0x24   :  { %787 = vmatmul.mubr.msk.bf16.gmra.mrb[12].mxu0 %vm188_vm0, %v856_v26  ;;  %371 = vperm.xlu0 %847, %v353_v28  }
  0x25   :  { %376 = vperm.xlu1 %848, %v354_v29  }
  0x28   :  { %381 = vperm.xlu0 %847, %v355_v30  }
  0x29   :  { %386 = vperm.xlu1 %848, %v356_v31  }
  0x2b   :  { %v866_v47 = vpop.eup %865 }
  0x2c   :  { %391 = vperm.xlu0 %847, %v357_v32  }
  0x2d   :  { %396 = vperm.xlu1 %848, %v358_v33  }
  0x30   :  { %401 = vperm.xlu0 %847, %v359_v34  }
  0x31   :  { %406 = vperm.xlu1 %848, %v360_v35  }
  0x34   :  { %411 = vperm.xlu0 %847, %v361_v36  }
  0x35   :  { %416 = vperm.xlu1 %848, %v362_v37  }
  0x38   :  { %421 = vperm.xlu0 %847, %v363_v39  }
  0x39   :  { %426 = vperm.xlu1 %848, %v364_v41  }
  0x3c   :  { %431 = vperm.xlu0 %847, %v365_v42  }
  0x3d   :  { %436 = vperm.xlu1 %848, %v366_v43  }
  0x40   :  { %441 = vperm.xlu0 %847, %v367_v44  }
  0x41   :  { %446 = vperm.xlu1 %848, %v368_v45  }
  0x44   :  { %680 = vperm.xlu0 %847, %v665_v38  }
  0x45   :  { %622 = vperm.xlu1 %848, %v619_v46  }
  0x48   :  { %671 = vperm.xlu0 %847, %v866_v47  }
  0x81   :  { %v81_v50 = vpop.permute.xlu1 %80 }
  0x83   :  { %v71_v49 = vpop.permute.xlu0 %70 }
  0x85   :  { %v86_v52 = vpop.permute.xlu1 %85 }
  0x87   :  { %v76_v51 = vpop.permute.xlu0 %75 }
  0x89   :  { %v96_v54 = vpop.permute.xlu1 %95 }
  0x8b   :  { %v91_v53 = vpop.permute.xlu0 %90 }
  0x8d   :  { %v106_v59 = vpop.permute.xlu1 %105 }
  0x8f   :  { %v101_v55 = vpop.permute.xlu0 %100 }
  0x91   :  { %v116_v7 = vpop.permute.xlu1 %115 }
  0x93   :  { %v111_v3 = vpop.permute.xlu0 %110 }
  0x97   :  { %v121_v16 = vpop.permute.xlu0 %120 }
  0x98   :  { %v126_v20 = vpop.permute.xlu1 %125 }
  0x9b   :  { %v131_v28 = vpop.permute.xlu0 %130 }
  0x9c   :  { %v136_v33 = vpop.permute.xlu1 %135 }
  0x9f   :  { %v141_v40 = vpop.permute.xlu0 %140 }
  0xa0   :  { %v146_v45 = vpop.permute.xlu1 %145 }
  0xdf   :  { %v776_v56 = vpop.f32.mrb[0].mxu0 }
  0xe0   :  { %v259_v57 = vadd.f32 %v776_v56, %v81_v50  ;;  %v250_v58 = vpop.f32.mrb[1].mxu0 }
  0xe1   :  { %v251_v60 = vadd.f32 %v250_v58, %v71_v49  ;;  %v777_v61 = vpop.f32.mrb[2].mxu0  ;;  %v859_v58 = vld [vmem:[%s1139_s4 + $0x10] sm:$0xff]  }
  0xe2   :  { %v262_v62 = vadd.f32 %v777_v61, %v86_v52  ;;  %v253_v63 = vpop.f32.mrb[3].mxu0  ;;  %v315_v1 = vmax.f32 %v259_v57, 0.0  ;;  %v858_v57 = vld [vmem:[%s1139_s4 + $0x8] sm:$0xff]  }
  0xe3   :  { %v254_v0 = vadd.f32 %v253_v63, %v76_v51  ;;  %v313_v4 = vmax.f32 %v251_v60, 0.0  ;;  %v861_v60 = vld [vmem:[%s1139_s4 + $0x20] sm:$0xff]   ;;  %v862_v61 = vld [vmem:[%s1139_s4 + $0x28] sm:$0xff]   ;;  %v864_v63 = vld [vmem:[%s1139_s4 + $0x38] sm:$0xff]  }
  0xe4   :  { %v316_v2 = vmax.f32 %v262_v62, 0.0  ;;  %v863_v62 = vld [vmem:[%s1139_s4 + $0x30] sm:$0xff]  }
  0xe5   :  { %v314_v5 = vmax.f32 %v254_v0, 0.0  ;;  %v892_v0 = vmov 0.0  }
  0xe6   :  { %v346_v6 = vpack.c.bf16 %v316_v2, %v315_v1  ;;  %822 = vmatprep.subr.bf16.mxu0 %v892_v0  ;;  %838 = vmatprep.mubr.msk.bf16.mxu0 %vm893_vm1, %v892_v0  ;;  %v372_v1 = vpop.permute.xlu0 %371  ;;  %v377_v2 = vpop.permute.xlu1 %376 }
  0xe7   :  { %v780_v8 = vpop.f32.mrb[4].mxu0  ;;  %v345_v9 = vpack.c.bf16 %v314_v5, %v313_v4 }
  0xe8   :  { %v275_v10 = vadd.f32 %v780_v8, %v101_v55  ;;  %v266_v11 = vpop.f32.mrb[5].mxu0 }
  0xe9   :  { %v267_v12 = vadd.f32 %v266_v11, %v91_v53  ;;  %v781_v13 = vpop.f32.mrb[6].mxu0  ;;  %790 = vmatprep.subr.bf16.mxu1 %v345_v9 }
  0xea   :  { %v278_v14 = vadd.f32 %v781_v13, %v106_v59  ;;  %v269_v15 = vpop.f32.mrb[7].mxu0  ;;  %791 = vmatpush3.bf16.msra.mxu1 %v345_v9  ;;  %v319_v18 = vmax.f32 %v275_v10, 0.0  ;;  %v860_v59 = vld [vmem:[%s1139_s4 + $0x18] sm:$0xff]   ;;  %v387_v4 = vpop.permute.xlu1 %386 }
  0xeb   :  { %v270_v17 = vadd.f32 %v269_v15, %v96_v54  ;;  %792 = vmatprep.subr.bf16.mxu1 %v346_v6  ;;  %v317_v21 = vmax.f32 %v267_v12, 0.0 }
  0xec   :  { %v320_v19 = vmax.f32 %v278_v14, 0.0 }
  0xed   :  { %v318_v22 = vmax.f32 %v270_v17, 0.0 }
  0xee   :  { %v348_v23 = vpack.c.bf16 %v320_v19, %v319_v18  ;;  %793 = vmatpush3.bf16.msra.mxu1 %v346_v6  ;;  %v397_v6 = vpop.permute.xlu1 %396 }
  0xef   :  { %v347_v24 = vpack.c.bf16 %v318_v22, %v317_v21  ;;  %v784_v25 = vpop.f32.mrb[8].mxu0 }
  0xf0   :  { %v291_v26 = vadd.f32 %v784_v25, %v121_v16  ;;  %v282_v27 = vpop.f32.mrb[9].mxu0 }
  0xf1   :  { %v283_v29 = vadd.f32 %v282_v27, %v111_v3  ;;  %v785_v30 = vpop.f32.mrb[10].mxu0  ;;  %794 = vmatprep.subr.bf16.mxu1 %v347_v24  ;;  %v382_v3 = vpop.permute.xlu0 %381 }
  0xf2   :  { %v294_v31 = vadd.f32 %v785_v30, %v126_v20  ;;  %v285_v32 = vpop.f32.mrb[11].mxu0  ;;  %795 = vmatpush3.bf16.msra.mxu1 %v347_v24  ;;  %v323_v35 = vmax.f32 %v291_v26, 0.0  ;;  %v407_v11 = vpop.permute.xlu1 %406 }
  0xf3   :  { %v286_v34 = vadd.f32 %v285_v32, %v116_v7  ;;  %796 = vmatprep.subr.bf16.mxu1 %v348_v23  ;;  %v321_v37 = vmax.f32 %v283_v29, 0.0 }
  0xf4   :  { %v324_v36 = vmax.f32 %v294_v31, 0.0 }
  0xf5   :  { %v322_v38 = vmax.f32 %v286_v34, 0.0  ;;  %v392_v5 = vpop.permute.xlu0 %391 }
  0xf6   :  { %v350_v39 = vpack.c.bf16 %v324_v36, %v323_v35  ;;  %797 = vmatpush3.bf16.msra.mxu1 %v348_v23  ;;  %v417_v23 = vpop.permute.xlu1 %416 }
  0xf7   :  { %v349_v41 = vpack.c.bf16 %v322_v38, %v321_v37  ;;  %v788_v42 = vpop.f32.mrb[12].mxu0 }
  0xf8   :  { %v307_v43 = vadd.f32 %v788_v42, %v141_v40  ;;  %v298_v44 = vpop.f32.mrb[13].mxu0 }
  0xf9   :  { %v299_v46 = vadd.f32 %v298_v44, %v131_v28  ;;  %v789_v47 = vpop.f32.mrb[14].mxu0  ;;  %798 = vmatprep.subr.bf16.mxu1 %v349_v41  ;;  %v402_v7 = vpop.permute.xlu0 %401 }
  0xfa   :  { %v310_v48 = vadd.f32 %v789_v47, %v146_v45  ;;  %v301_v49 = vpop.f32.mrb[15].mxu0  ;;  %799 = vmatpush3.bf16.msra.mxu1 %v349_v41  ;;  %v327_v51 = vmax.f32 %v307_v43, 0.0  ;;  %v427_v36 = vpop.permute.xlu1 %426 }
  0xfb   :  { %v302_v50 = vadd.f32 %v301_v49, %v136_v33  ;;  %800 = vmatprep.subr.bf16.mxu1 %v350_v39  ;;  %v325_v53 = vmax.f32 %v299_v46, 0.0 }
  0xfc   :  { %v328_v52 = vmax.f32 %v310_v48, 0.0 }
  0xfd   :  { %v326_v54 = vmax.f32 %v302_v50, 0.0  ;;  %v412_v19 = vpop.permute.xlu0 %411 }
  0xfe   :  { %v352_v55 = vpack.c.bf16 %v328_v52, %v327_v51  ;;  %801 = vmatpush3.bf16.msra.mxu1 %v350_v39  ;;  %v437_v49 = vpop.permute.xlu1 %436 }
  0xff   :  { %v351_v56 = vpack.c.bf16 %v326_v54, %v325_v53 }
 0x101   :  { %802 = vmatprep.subr.bf16.mxu1 %v351_v56  ;;  %v422_v32 = vpop.permute.xlu0 %421 }
 0x102   :  { %803 = vmatpush3.bf16.msra.mxu1 %v351_v56 }
 0x103   :  { %804 = vmatprep.subr.bf16.mxu1 %v352_v55 }
 0x105   :  { %v432_v44 = vpop.permute.xlu0 %431 }
 0x106   :  { %805 = vmatpush3.bf16.msra.mxu1 %v352_v55 }
 0x109   :  { %807 = vmatmul.mubr.bf16.vlgmr.msra.gmra.mrb[0].mxu1 %v858_v57  ;;  %v442_v56 = vpop.permute.xlu0 %441 }
 0x10a   :  { %810 = vmatprep.mubr.bf16.mxu1 %v859_v58 }
 0x111   :  { %811 = vmatmul.mubr.bf16.gmra.mrb[4].mxu1 %v860_v59 }
 0x112   :  { %814 = vmatprep.mubr.bf16.mxu1 %v861_v60 }
 0x119   :  { %815 = vmatmul.mubr.bf16.gmra.mrb[8].mxu1 %v862_v61  ;;  %v447_v61 = vpop.permute.xlu1 %446 }
 0x11a   :  { %818 = vmatprep.mubr.bf16.mxu1 %v863_v62 }
 0x121   :  { %819 = vmatmul.mubr.bf16.gmra.mrb[12].mxu1 %v864_v63 }
 0x1dc   :  { %v808_v8 = vpop.f32.mrb[0].mxu1 }
 0x1dd   :  { %v540_v9 = vadd.f32 %v808_v8, %v382_v3  ;;  %v531_v10 = vpop.f32.mrb[1].mxu1 }
 0x1de   :  { %v532_v12 = vadd.f32 %v531_v10, %v372_v1  ;;  %v809_v13 = vpop.f32.mrb[2].mxu1  ;;  %v610_v10 = vld [vmem:[%s1141_s6] sm:$0x3] }
 0x1df   :  { %v543_v14 = vadd.f32 %v809_v13, %v387_v4  ;;  %v534_v15 = vpop.f32.mrb[3].mxu1  ;;  %v596_v17 = vmax.f32 %v540_v9, 0.0 }
 0x1e0   :  { %v535_v16 = vadd.f32 %v534_v15, %v377_v2  ;;  %v594_v20 = vmax.f32 %v532_v12, 0.0 }
 0x1e1   :  { %v597_v18 = vmax.f32 %v543_v14, 0.0  ;;  %v681_v14 = vpop.permute.xlu0 %680 }
 0x1e2   :  { %v595_v21 = vmax.f32 %v535_v16, 0.0 }
 0x1e3   :  { %v612_v22 = vpack.c.bf16 %v597_v18, %v596_v17 }
 0x1e4   :  { %v611_v24 = vpack.c.bf16 %v595_v21, %v594_v20  ;;  %v812_v25 = vpop.f32.mrb[4].mxu1 }
 0x1e5   :  { %v556_v26 = vadd.f32 %v812_v25, %v402_v7  ;;  %v547_v27 = vpop.f32.mrb[5].mxu1  ;;  %v672_v21 = vpop.permute.xlu0 %671 }
 0x1e6   :  { %v548_v28 = vadd.f32 %v547_v27, %v392_v5  ;;  %v813_v29 = vpop.f32.mrb[6].mxu1  ;;  %823 = vmatpush3.bf16.msra.mxu0 %v611_v24 }
 0x1e7   :  { %v559_v30 = vadd.f32 %v813_v29, %v407_v11  ;;  %v550_v31 = vpop.f32.mrb[7].mxu1  ;;  %824 = vmatprep.subr.bf16.mxu0 %v892_v0  ;;  %v600_v34 = vmax.f32 %v556_v26, 0.0  ;;  %v668_v11 = vld [vmem:[%s1136_s1] sm:$0xf]  ;;  %s894_s1 = smov [#allocation2]  }
 0x1e8   :  { %v551_v33 = vadd.f32 %v550_v31, %v397_v6  ;;  %v598_v37 = vmax.f32 %v548_v28, 0.0  ;;  %v676_v12 = vmul.f32 %v668_v11, %v668_v11  ;;  %v674_v25 = vmul.f32 %v672_v21, %v668_v11  ;;  %s705_s6 = sshll.u32 %s894_s1, 4  ;;  %s706_s6 = int_to_ptr.vmem [resolvable:$true] %s705_s6 }
 0x1e9   :  { %v601_v35 = vmax.f32 %v559_v30, 0.0  ;;  %s867_s18 = scalar_lea.vmem %s706_s6, 128  ;;  %p872_p1 = scmp.lt.s32.totalorder %s706_s6, %s706_s6 }
 0x1ea   :  { %v599_v38 = vmax.f32 %v551_v33, 0.0  ;;  %825 = vmatpush3.bf16.msra.mxu0 %v612_v22  ;;  %v677_v13 = vmul.f32 -0.5, %v676_v12  ;;  %p868_p0 = scmp.ne.s32.totalorder %s706_s6, %s867_s18  ;;  %p873_p2 = scmp.lt.s32.totalorder %s867_s18, %s867_s18 }
 0x1eb   :  { %v614_v39 = vpack.c.bf16 %v601_v35, %v600_v34  ;;  %826 = vmatprep.subr.bf16.mxu0 %v892_v0 }
 0x1ec   :  { %v613_v40 = vpack.c.bf16 %v599_v38, %v598_v37  ;;  %v816_v41 = vpop.f32.mrb[8].mxu1  ;;  %v683_v15 = vsub.f32 %v677_v13, %v681_v14  ;;  %p874_p3 = por %p873_p2, %p872_p1 }
 0x1ed   :  { %v572_v42 = vadd.f32 %v816_v41, %v422_v32  ;;  %v563_v43 = vpop.f32.mrb[9].mxu1 }
 0x1ee   :  { %v564_v45 = vadd.f32 %v563_v43, %v412_v19  ;;  %v817_v46 = vpop.f32.mrb[10].mxu1  ;;  %827 = vmatpush3.bf16.msra.mxu0 %v613_v40  ;;  %v737_v16 = vadd.f32 -0.9189385, %v683_v15  ;;  %p875_p4 = pnand %p874_p3, %p868_p0 }
 0x1ef   :  { %v575_v47 = vadd.f32 %v817_v46, %v427_v36  ;;  %v566_v48 = vpop.f32.mrb[11].mxu1  ;;  %828 = vmatprep.subr.bf16.mxu0 %v892_v0  ;;  %v604_v51 = vmax.f32 %v572_v42, 0.0 }
 0x1f0   :  { %v567_v50 = vadd.f32 %v566_v48, %v417_v23  ;;  %v602_v53 = vmax.f32 %v564_v45, 0.0  ;;  %v686_v17 = vsel %vm685_vm2, %v737_v16, 0.0  ;;  %v623_v23 = vpop.permute.xlu1 %622 }
 0x1f1   :  { %v605_v52 = vmax.f32 %v575_v47, 0.0  ;;  %v687_v18 = vrot.slane %v686_v17, 4 }
 0x1f2   :  { %v603_v54 = vmax.f32 %v567_v50, 0.0  ;;  %829 = vmatpush3.bf16.msra.mxu0 %v614_v39 }
 0x1f3   :  { %v616_v55 = vpack.c.bf16 %v605_v52, %v604_v51  ;;  %830 = vmatprep.subr.bf16.mxu0 %v892_v0  ;;  %v688_v19 = vadd.f32 %v687_v18, %v686_v17 }
 0x1f4   :  { %v615_v57 = vpack.c.bf16 %v603_v54, %v602_v53  ;;  %v820_v58 = vpop.f32.mrb[12].mxu1 }
 0x1f5   :  { %v588_v59 = vadd.f32 %v820_v58, %v442_v56  ;;  %v579_v60 = vpop.f32.mrb[13].mxu1 }
 0x1f6   :  { %v580_v62 = vadd.f32 %v579_v60, %v432_v44  ;;  %v821_v63 = vpop.f32.mrb[14].mxu1  ;;  %831 = vmatpush3.bf16.msra.mxu0 %v615_v57 }
 0x1f7   :  { %v591_v1 = vadd.f32 %v821_v63, %v447_v61  ;;  %v582_v2 = vpop.f32.mrb[15].mxu1  ;;  %832 = vmatprep.subr.bf16.mxu0 %v892_v0  ;;  %v608_v4 = vmax.f32 %v588_v59, 0.0 }
 0x1f8   :  { %v583_v3 = vadd.f32 %v582_v2, %v437_v49  ;;  %v606_v6 = vmax.f32 %v580_v62, 0.0 }
 0x1f9   :  { %v609_v5 = vmax.f32 %v591_v1, 0.0 }
 0x1fa   :  { %v607_v7 = vmax.f32 %v583_v3, 0.0  ;;  %833 = vmatpush3.bf16.msra.mxu0 %v616_v55 }
 0x1fb   :  { %v618_v8 = vpack.c.bf16 %v609_v5, %v608_v4  ;;  %834 = vmatprep.subr.bf16.mxu0 %v892_v0 }
 0x1fc   :  { %v617_v9 = vpack.c.bf16 %v607_v7, %v606_v6 }
 0x1fe   :  { %835 = vmatpush3.bf16.msra.mxu0 %v617_v9 }
 0x1ff   :  { %836 = vmatprep.subr.bf16.mxu0 %v892_v0  ;;  %v689_v0 = vrot.slane %v688_v19, 2 }
 0x201   :  { %v690_v20 = vadd.f32 %v689_v0, %v688_v19 }
 0x202   :  { %837 = vmatpush3.bf16.msra.mxu0 %v618_v8 }
 0x203   :  { %v691_v22 = vrot.slane %v690_v20, 1 }
 0x205   :  { %839 = vmatmul.mubr.bf16.vlgmr.msra.gmra.mrb[16].mxu0 %v610_v10  ;;  %v692_v29 = vadd.f32 %v691_v22, %v690_v20 }
 0x2d8   :  { %v659_v24 = vpop.f32.mrb[16].mxu0 }
 0x2d9   :  { %v660_v26 = vadd.f32 %v659_v24, %v623_v23  ;;  %v840_v27 = vpop.f32.mrb[17].mxu0 }
 0x2da   :  { %v662_v28 = vpop.f32.mrb[18].mxu0 }
 0x2db   :  { %v675_v30 = vadd.f32 %v674_v25, %v660_v26  ;;  %v841_v31 = vpop.f32.mrb[19].mxu0 }
 0x2dd   :  { %v694_v32 = vsel %vm693_vm3, %v675_v30, %v692_v29 }
 0x2de   :  { %v696_v33 = vsel %vm695_vm4, %v694_v32, 0.0 }
 0x2df   :  { %698 = vst.msk [vmem:[#allocation2] sm:$0xff] %vm697_vm5, %v696_v33 }
 0x2e0   :  { %878 = shalt.err (!%p875_p4)
}
 0x2e1   :  { %s879_s19 = scalar_lea.hbm %s1144_s9, 128 }
 0x2e2   :  { %p880_p5 = scmp.ne.s32.totalorder %s1144_s9, %s879_s19  ;;  %p883_p6 = scmp.lt.u32.totalorder %s879_s19, %s1144_s9 }
 0x2e4   :  { %p885_p7 = pnand %p883_p6, %p880_p5 }
 0x2e6   :  { %888 = shalt.err (!%p885_p7)
}
 0x2e7   :  { %708 = dma.vmem_to_hbm [thread:$0]  %s706_s6, 128, %s1144_s9, [#allocation3]  }
 0x2e8   :  { %889 = dma.done.wait [#allocation3], 128  }
 0x2e9   :  { %890 = vsyncadd [#allocation3], 4294967168 }
 0x2ea   :  { %712 = vsyncpa [#allocation3], 1 }

</bundles_post_ra>
